<compile_context>
chip_gen: v7x
topology: tpu7x:2x2x1
jax: 0.10.0
libtpu: 0.0.40
codegen_flags: <defaults>
</compile_context>

<pallas_src>
import jax
import jax.numpy as jnp
from jax.experimental import pallas as pl
from jax.experimental.pallas import tpu as pltpu

_LANE = 128


def _leaky_relu_kernel(slope_ref, x_ref, o_ref):
    x = x_ref[...]
    # Slope lives in SMEM; cast to the input dtype -> in-dtype multiply, same
    # as PyTorch (slope itself is rounded to that dtype).
    slope = slope_ref[0].astype(x.dtype)
    # Matches: input * (input >= 0) + negative_slope * input * (input < 0)
    o_ref[...] = jnp.where(x >= 0, x, slope * x)


def _device_kind():
    try:
        return jax.devices()[0].device_kind.lower()
    except Exception:
        return ""


def _run(arr, block_shape, grid, index_map, slope_arr, *, semantics, vmem_limit, donate):
    extra = {}
    if donate:
        # Input 1 is the data slab; reuse its buffer for the output.  Only a
        # real win if the caller also donates at the jit boundary.
        extra["input_output_aliases"] = {1: 0}
    return pl.pallas_call(
        _leaky_relu_kernel,
        out_shape=jax.ShapeDtypeStruct(arr.shape, arr.dtype),
        grid_spec=pltpu.PrefetchScalarGridSpec(
            num_scalar_prefetch=0,
            grid=grid,
            in_specs=[
                pl.BlockSpec(memory_space=pltpu.MemorySpace.SMEM),  # slope scalar
                pl.BlockSpec(block_shape, index_map),
            ],
            out_specs=pl.BlockSpec(block_shape, index_map),
        ),
        compiler_params=pltpu.CompilerParams(
            dimension_semantics=semantics,
            vmem_limit_bytes=vmem_limit,
        ),
        **extra,
    )(slope_arr, arr)


def leaky_relu(x, negative_slope=0.01, donate_input=False):
    """LeakyReLU forward, elementwise, identical semantics to the PyTorch module."""
    orig_shape = x.shape
    dtype = x.dtype
    n = x.size
    if n == 0:
        return x

    itemsize = jnp.dtype(dtype).itemsize
    # Native sublane packing: 8 rows/vreg for 32-bit, 16 for 16-bit, 32 for 8-bit.
    sublane_pack = max(8, 32 // itemsize)

    kind = _device_kind()
    is_v7 = "7" in kind
    is_v6 = ("v6" in kind) and not is_v7

    # Tile budget: 2 MiB everywhere (in+out double-buffered = 8 MiB, safe under
    # v5e's 16 MiB scoped default and small per-core on v7x's 64 MiB VMEM);
    # 4 MiB on v6e (16 MiB total, well inside 32 MiB scoped / 128 MiB physical).
    tile_bytes = (4 << 20) if is_v6 else (2 << 20)
    vmem_limit = (64 << 20) if is_v6 else None

    tile_rows_target = max(sublane_pack, tile_bytes // (_LANE * itemsize))
    tile_rows_target -= tile_rows_target % sublane_pack  # keep (8,128)-legal

    slope_arr = jnp.asarray([negative_slope], dtype=jnp.float32)

    if n % _LANE == 0:
        # Common case: pure metadata reshape to a lane-dense (rows, 128) slab.
        rows = n // _LANE
        arr = x.reshape(rows, _LANE)
        if rows <= tile_rows_target:
            block = (rows, _LANE)              # full-extent block, always legal
            grid = (1,)
        else:
            block = (tile_rows_target, _LANE)  # multiple of (8,128); ragged last
            grid = (pl.cdiv(rows, tile_rows_target),)
        index_map = lambda i: (i, 0)
    else:
        # Ragged element count: feed the flat 1-D view directly (no pad, no
        # slice-out -> exactly one HBM read + one HBM write).  A partial final
        # block reads clamped/garbage data but its out-of-bounds stores are
        # masked, which is safe for a pure elementwise op.
        arr = x.reshape(-1)
        tile_elems = tile_rows_target * _LANE
        if n <= tile_elems:
            block = (n,)                       # single full-extent 1-D block
            grid = (1,)
        else:
            block = (tile_elems,)              # multiple of 8*128 lanes
            grid = (pl.cdiv(n, tile_elems),)
        index_map = lambda i: (i,)

    semantics = ("arbitrary",)
    core_parallel = getattr(pltpu, "CORE_PARALLEL", None)
    if is_v7 and grid[0] > 1 and core_parallel is not None:
        # Actually split grid steps across v7x's two TensorCores; a plain
        # "parallel" hint does not change codegen for this.
        semantics = (core_parallel,)

    try:
        out = _run(arr, block, grid, index_map, slope_arr,
                   semantics=semantics, vmem_limit=vmem_limit, donate=donate_input)
    except Exception:
        if semantics == ("arbitrary",):
            raise
        # Safety net: fall back to the single-core schedule if CORE_PARALLEL is
        # rejected by the running toolchain.
        out = _run(arr, block, grid, index_map, slope_arr,
                   semantics=("arbitrary",), vmem_limit=vmem_limit, donate=donate_input)

    return out.reshape(orig_shape)


def leaky_relu_ref(x, negative_slope=0.01):
    # Pure-JAX reference mirroring the PyTorch expression exactly.
    return x * (x >= 0) + negative_slope * x * (x < 0)


if __name__ == "__main__":
    key = jax.random.PRNGKey(0)
    # Small NCHW input consistent with a conv-net activation: batch=2, C=4, H=W=16.
    x = jax.random.normal(key, (2, 4, 16, 16), dtype=jnp.float32)

    y = jax.block_until_ready(leaky_relu(x, negative_slope=0.01))
    y_ref = leaky_relu_ref(x, negative_slope=0.01)
    assert y.shape == x.shape and y.dtype == x.dtype
    assert jnp.allclose(y, y_ref, atol=1e-6, rtol=1e-6)

    # Exercise the ragged path (element count not a multiple of 128): no pad,
    # no slice — flat 1-D view processed in place.
    x2 = jax.random.normal(jax.random.PRNGKey(0), (3, 5, 7), dtype=jnp.float32)
    y2 = jax.block_until_ready(leaky_relu(x2, negative_slope=0.2))
    assert y2.shape == x2.shape and y2.dtype == x2.dtype
    assert jnp.allclose(y2, leaky_relu_ref(x2, negative_slope=0.2), atol=1e-6, rtol=1e-6)

    print("KERNEL_OK")
</pallas_src>

<mosaic_0001>
module attributes {stable_mosaic.version = 11 : i64} {
  func.func @_leaky_relu_kernel(%arg0: i32, %arg1: memref<1xf32, #tpu.memory_space<smem>>, %arg2: memref<16x128xf32, #tpu.memory_space<vmem>>, %arg3: memref<16x128xf32, #tpu.memory_space<vmem>>) attributes {dimension_semantics = [#tpu.dimension_semantics<arbitrary>], iteration_bounds = array<i64: 1>, scalar_prefetch = 0 : i64, scratch_operands = 0 : i64, tpu.core_type = #tpu.core_type<tc>, window_params = [{transform_indices = @transform_0, window_bounds = array<i64: 1>}, {transform_indices = @transform_1, window_bounds = array<i64: 16, 128>}, {transform_indices = @transform_2, window_bounds = array<i64: 16, 128>}]} {
    %c0 = arith.constant 0 : index
    %c0_0 = arith.constant 0 : index
    %0 = vector.load %arg2[%c0, %c0_0] : memref<16x128xf32, #tpu.memory_space<vmem>>, vector<16x128xf32>
    %c0_1 = arith.constant 0 : index
    %1 = memref.load %arg1[%c0_1] : memref<1xf32, #tpu.memory_space<smem>>
    %cst = arith.constant 0.000000e+00 : f32
    %2 = vector.broadcast %cst : f32 to vector<16x128xf32>
    %3 = arith.cmpf oge, %0, %2 : vector<16x128xf32>
    %4 = vector.broadcast %1 : f32 to vector<16x128xf32>
    %5 = arith.mulf %4, %0 : vector<16x128xf32>
    %6 = arith.select %3, %0, %5 : vector<16x128xi1>, vector<16x128xf32>
    %c0_2 = arith.constant 0 : index
    %c0_3 = arith.constant 0 : index
    %7 = vector.load %arg3[%c0_2, %c0_3] : memref<16x128xf32, #tpu.memory_space<vmem>>, vector<16x128xf32>
    tpu.vector_store %arg3[%c0_2, %c0_3], %6 {strides = array<i32>} : memref<16x128xf32, #tpu.memory_space<vmem>>, vector<16x128xf32>,
    return
  }
  func.func @transform_0(%arg0: i32) -> i32 {
    %c0_i32 = arith.constant 0 : i32
    %c0_i32_0 = arith.constant 0 : i32
    return %c0_i32 : i32
  }
  func.func @transform_1(%arg0: i32) -> (i32, i32) {
    %c0_i32 = arith.constant 0 : i32
    %c0_i32_0 = arith.constant 0 : i32
    return %arg0, %c0_i32 : i32, i32
  }
  func.func @transform_2(%arg0: i32) -> (i32, i32) {
    %c0_i32 = arith.constant 0 : i32
    %c0_i32_0 = arith.constant 0 : i32
    return %arg0, %c0_i32 : i32, i32
  }
}

</mosaic_0001>

<bundles_post_ra>
// kernel: tpu_custom_call.1
= control target key start
LH: loop header
LB: loop body
LE: loop exit
PB: predicated region body
PF: predicated region fallthrough
CT: control target
= control target key end

     0   :  { %8 = vsyncpa [#allocation4], 0  ;;  %s160_s0 = inlined_call_operand.<no memory space> [shape: f32[1], index: 0, kind: input, shape index: {}]   ;;  %s161_s1 = inlined_call_operand.hbm [shape: f32[16,128], index: 1, kind: input, shape index: {}]   ;;  %s162_s2 = inlined_call_operand.hbm [shape: f32[16,128], index: 2, kind: output, shape index: {}]  }
   0x1   :  { %9 = vsyncpa [#allocation5], 0  ;;  %s108_s9 = smov [#allocation3]   ;;  %s60_s13 = scalar_lea.hbm %s161_s1, 256 }
   0x2   :  { %s17_s10 = sshll.u32 %s108_s9, 4  ;;  %p61_p0 = scmp.ne.s32.totalorder %s161_s1, %s60_s13  ;;  %s18_s10 = int_to_ptr.vmem [resolvable:$true] %s17_s10 }
   0x3   :  { %p64_p1 = scmp.lt.u32.totalorder %s60_s13, %s161_s1 }
   0x5   :  { %p66_p2 = pnand %p64_p1, %p61_p0 }
   0x7   :  { %69 = shalt.err (!%p66_p2)
}
   0x8   :  { %s70_s18 = scalar_lea.vmem %s18_s10, 256  ;;  %p75_p4 = scmp.lt.s32.totalorder %s18_s10, %s18_s10 }
   0x9   :  { %p71_p3 = scmp.ne.s32.totalorder %s18_s10, %s70_s18  ;;  %p76_p5 = scmp.lt.s32.totalorder %s70_s18, %s70_s18 }
   0xb   :  { %p77_p6 = por %p76_p5, %p75_p4 }
   0xd   :  { %p78_p7 = pnand %p77_p6, %p71_p3 }
   0xf   :  { %81 = shalt.err (!%p78_p7)
}
  0x10   :  { %s109_s19 = smov 128   ;;  %s110_s20 = smov 8  }
  0x11   :  { %23 = dma.hbm_to_vmem [thread:$0]  %s161_s1, 256, %s18_s10, [#allocation4], %s109_s19, %s109_s19, %s110_s20  }
  0x12   :  { %104 = dma.done.wait [#allocation4], 256  }
  0x13   :  { %105 = vsyncadd [#allocation4], 4294967040  ;;  %v32_v0 = vstv %s160_s0  ;;  %s111_s25 = smov [#allocation6]   ;;  %v27_v1 = vld [vmem:[#allocation3] sm:$0xff]  ;;  %v28_v2 = vld [vmem:[#allocation3 + $0x8] sm:$0xff] }
  0x14   :  { %s44_s26 = sshll.u32 %s111_s25, 4  ;;  %vm30_vm0 = vcmp.ge.f32.partialorder %v27_v1, 0.0  ;;  %v33_v3 = vmul.f32 %v32_v0, %v27_v1  ;;  %vm31_vm1 = vcmp.ge.f32.partialorder %v28_v2, 0.0  ;;  %v34_v4 = vmul.f32 %v32_v0, %v28_v2  ;;  %s45_s26 = int_to_ptr.vmem [resolvable:$true] %s44_s26 }
  0x15   :  { %s82_s1 = scalar_lea.vmem %s45_s26, 256  ;;  %p87_p9 = scmp.lt.s32.totalorder %s45_s26, %s45_s26 }
  0x16   :  { %v35_v5 = vsel %vm30_vm0, %v27_v1, %v33_v3  ;;  %v36_v6 = vsel %vm31_vm1, %v28_v2, %v34_v4  ;;  %p83_p8 = scmp.ne.s32.totalorder %s45_s26, %s82_s1  ;;  %p88_p10 = scmp.lt.s32.totalorder %s82_s1, %s82_s1 }
  0x17   :  { %37 = vst [vmem:[#allocation6] sm:$0xff] %v35_v5  ;;  %38 = vst [vmem:[#allocation6 + $0x8] sm:$0xff] %v36_v6 }
  0x18   :  { %p89_p11 = por %p88_p10, %p87_p9 }
  0x1a   :  { %p90_p12 = pnand %p89_p11, %p83_p8 }
  0x1c   :  { %93 = shalt.err (!%p90_p12)
}
  0x1d   :  { %s94_s28 = scalar_lea.hbm %s162_s2, 256 }
  0x1e   :  { %p95_p13 = scmp.ne.s32.totalorder %s162_s2, %s94_s28  ;;  %p98_p0 = scmp.lt.u32.totalorder %s94_s28, %s162_s2 }
  0x20   :  { %p100_p1 = pnand %p98_p0, %p95_p13 }
  0x22   :  { %103 = shalt.err (!%p100_p1)
}
  0x23   :  { %50 = dma.vmem_to_hbm [thread:$0]  %s45_s26, 256, %s162_s2, [#allocation5], %s109_s19, %s109_s19, %s110_s20  }
  0x24   :  { %106 = dma.done.wait [#allocation5], 256  }
  0x25   :  { %107 = vsyncadd [#allocation5], 4294967040 }
  0x26   :  { %54 = vsyncpa [#allocation4], 1 }
  0x27   :  { %55 = vsyncpa [#allocation5], 1 }

</bundles_post_ra>
